<compile_context>
chip_gen: v6e
topology: v6e:2x2x1
jax: 0.10.0
libtpu: 0.0.40
codegen_flags: <defaults>
</compile_context>

<pallas_src>
import jax
import jax.numpy as jnp
from jax.experimental import pallas as pl
from jax.experimental.pallas import tpu as pltpu

# torch.finfo(torch.float32).eps (torch default dtype is float32)
EPS = float(jnp.finfo(jnp.float32).eps)

_MIB = 1024 * 1024


# ---------------------------------------------------------------------------
# Hardware / sizing helpers
# ---------------------------------------------------------------------------
def _round_up(x, m):
    return ((x + m - 1) // m) * m


def _sublane_align(itemsize):
    # Native sublane tiling: 8 rows for 32-bit, 16 for 16-bit, 32 for 8-bit.
    return 8 * max(1, 4 // int(itemsize))


def _phys_block_bytes(rows, cols, itemsize):
    """Physical VMEM footprint of a (rows, cols) block (tiling-padded)."""
    itemsize = int(itemsize)
    return (_round_up(rows, _sublane_align(itemsize))
            * _round_up(cols, 128) * itemsize)


def _vmem_capacity_bytes():
    """Per-core VMEM capacity; conservative (v7x: 64 MiB) when unknown."""
    try:
        cap = getattr(pltpu.get_tpu_info(), "vmem_capacity_bytes", None)
        if cap:
            return int(cap)
    except Exception:
        pass
    try:
        kind = jax.devices()[0].device_kind.lower()
        if "v4" in kind or "v5" in kind or "v6" in kind:
            return 128 * _MIB
    except Exception:
        pass
    return 64 * _MIB


def _plan_k_tiling(K, quantum, max_tile_elems):
    """Pick a K-tile size.

    Prefers the largest aligned divisor of K not exceeding the budget (no
    padding); otherwise returns a budget-sized aligned tile plus the padded K
    (zero padding is harmless: the kernel divides by the true element count).
    """
    cap = max(quantum, (max_tile_elems // quantum) * quantum)
    best_div = None
    t = quantum
    limit = min(cap, K)
    while t <= limit:
        if K % t == 0:
            best_div = t
        t += quantum
    if best_div is not None:
        return best_div, K
    tile = min(cap, _round_up(K, quantum))
    return tile, _round_up(K, tile)


# ---------------------------------------------------------------------------
# Kernels
# ---------------------------------------------------------------------------
def _gln_full_kernel(y_ref, gamma_ref, beta_ref, o_ref):
    """One grid step == one full (channel, length) slab of one batch element.

    Exact two-pass mean/variance (the slab is VMEM-resident so the second
    statistics pass costs no HBM traffic).  1 HBM read + 1 HBM write.
    """
    yf = y_ref[...].astype(jnp.float32)                     # (1, A, B)
    inv_n = 1.0 / float(yf.size)
    mean = jnp.sum(yf, keepdims=True) * inv_n               # (1, 1, 1)
    centered = yf - mean
    var = jnp.sum(centered * centered, keepdims=True) * inv_n
    scale = gamma_ref[...].astype(jnp.float32) * jax.lax.rsqrt(var + EPS)
    o_ref[...] = (centered * scale
                  + beta_ref[...].astype(jnp.float32)).astype(o_ref.dtype)


def _make_tiled_kernel(inv_n, layout, resident):
    """Two-phase kernel for grid (M, 2, num_kt).

    phase 0: stream K-tiles from HBM, accumulate sum / sumsq (and, if
             `resident`, copy each tile into a VMEM slab scratch).
    phase 1: normalize each tile (from the slab scratch when `resident`,
             otherwise re-streamed from HBM) with a single fused FMA.
    """
    del layout  # layout only affects wrapper-side BlockSpecs / scratch shapes

    def kernel(y_ref, gamma_ref, beta_ref, o_ref, sum_ref, sq_ref, *rest):
        slab_ref = rest[0] if resident else None
        phase = pl.program_id(1)
        kt = pl.program_id(2)

        @pl.when(jnp.logical_and(phase == 0, kt == 0))
        def _():
            sum_ref[...] = jnp.zeros_like(sum_ref)
            sq_ref[...] = jnp.zeros_like(sq_ref)

        @pl.when(phase == 0)
        def _():
            yf = y_ref[...].astype(jnp.float32)
            # One-pass sum / sum-of-squares in the same read of the tile.
            # TODO(synk): shifted/Welford accumulation if inputs can be far
            # from zero-mean (catastrophic cancellation in f32).
            sum_ref[...] += jnp.sum(yf, keepdims=True)
            sq_ref[...] += jnp.sum(yf * yf, keepdims=True)
            if resident:
                # Keep the raw tile on-chip so phase 1 never touches HBM reads.
                slab_ref[pl.ds(kt, 1)] = y_ref[...]

        @pl.when(phase == 1)
        def _():
            mean = sum_ref[...] * inv_n                      # (1, 1, 1)
            var = jnp.maximum(sq_ref[...] * inv_n - mean * mean, 0.0)
            inv_std = jax.lax.rsqrt(var + EPS)
            # scale/shift are O(N) VPU work per tile -- negligible vs the
            # O(N*tile) normalize; recomputed rather than cached.
            scale = gamma_ref[...].astype(jnp.float32) * inv_std
            shift = beta_ref[...].astype(jnp.float32) - mean * scale
            if resident:
                y_tile = slab_ref[pl.ds(kt, 1)]              # VMEM, no HBM read
            else:
                y_tile = y_ref[...]                          # second HBM read
            yf = y_tile.astype(jnp.float32)
            o_ref[...] = (yf * scale + shift).astype(o_ref.dtype)

    return kernel


# ---------------------------------------------------------------------------
# Wrapper
# ---------------------------------------------------------------------------
def global_layer_norm(y, gamma, beta, shape="BDT",
                      full_block_budget_bytes=None,
                      tile_budget_bytes=None,
                      slab_budget_bytes=None,
                      vmem_limit_bytes=None):
    """gLN forward.

    Args:
        y: [M, N, K] if shape == 'BDT', else [M, K, N].  No transpose is
           performed for 'BTD' -- the layout is handled in the BlockSpecs.
        gamma, beta: [1, channel_size, 1] (as in the PyTorch module).
        *_budget_bytes / vmem_limit_bytes: optional overrides (testing /
           tuning); defaults are derived from the device's VMEM capacity and
           y.dtype.itemsize.
    Returns:
        Same shape/dtype as y.
    """
    assert shape in ("BDT", "BTD")
    M, d1, d2 = y.shape
    itemsize = int(jnp.dtype(y.dtype).itemsize)

    if shape == "BDT":
        N, K = d1, d2          # channels on sublanes, length on lanes
        k_quantum = 128        # tile the last (lane) axis in 128-multiples
        gamma_b = jnp.reshape(gamma, (1, N, 1))
        beta_b = jnp.reshape(beta, (1, N, 1))
    else:                      # 'BTD': y is [M, K, N] -- no transpose needed
        K, N = d1, d2          # length on sublanes, channels on lanes
        k_quantum = 8          # tile the second-last (sublane) axis
        gamma_b = jnp.reshape(gamma, (1, 1, N))
        beta_b = jnp.reshape(beta, (1, 1, N))

    param_block = gamma_b.shape
    n_true = N * K
    inv_n = 1.0 / float(n_true)

    def _block_bytes(k_elems, isz):
        if shape == "BDT":
            return _phys_block_bytes(N, k_elems, isz)
        return _phys_block_bytes(k_elems, N, isz)

    # ---- generation- and dtype-aware budgets -------------------------------
    cap = _vmem_capacity_bytes()
    if vmem_limit_bytes is None:
        vmem_limit_bytes = (3 * cap) // 4     # ~96 MiB v5e/v6e, ~48 MiB v7x
    vmem_limit_bytes = int(vmem_limit_bytes)
    avail = vmem_limit_bytes - 4 * _MIB       # headroom for small temps

    # Full path: in+out blocks double-buffered (dtype) + ~3 f32 temporaries.
    if full_block_budget_bytes is None:
        use_full = (4 * _block_bytes(K, itemsize)
                    + 3 * _block_bytes(K, 4)) <= avail
    else:
        use_full = d1 * d2 * itemsize <= full_block_budget_bytes

    dim_sem_batch = "parallel"                # megacore-shard the batch axis

    if use_full:
        # One full (channel, length) slab per batch element: 1 read + 1 write.
        block = (1, d1, d2)
        cost = pl.CostEstimate(
            flops=7 * M * n_true,
            transcendentals=M,
            bytes_accessed=2 * M * n_true * itemsize,
        )
        return pl.pallas_call(
            _gln_full_kernel,
            out_shape=jax.ShapeDtypeStruct(y.shape, y.dtype),
            grid_spec=pltpu.PrefetchScalarGridSpec(
                num_scalar_prefetch=0,
                grid=(M,),
                in_specs=[
                    pl.BlockSpec(block, lambda m: (m, 0, 0)),
                    pl.BlockSpec(param_block, lambda m: (0, 0, 0)),
                    pl.BlockSpec(param_block, lambda m: (0, 0, 0)),
                ],
                out_specs=pl.BlockSpec(block, lambda m: (m, 0, 0)),
            ),
            compiler_params=pltpu.CompilerParams(
                dimension_semantics=(dim_sem_batch,),
                vmem_limit_bytes=vmem_limit_bytes,
            ),
            cost_estimate=cost,
        )(y, gamma_b, beta_b)

    # ---------------- tiled paths (slab too big for one pipelined block) ----
    if tile_budget_bytes is None:
        tile_budget_bytes = min(2 * _MIB, max(256 * 1024, avail // 16))
    max_tile_elems = max(1, int(tile_budget_bytes) // (N * itemsize))
    tile, K_pad = _plan_k_tiling(K, k_quantum, max_tile_elems)
    num_kt = K_pad // tile

    # Middle path (VMEM-resident slab, 1 HBM read) vs far path (re-stream).
    tile_usage = 4 * _block_bytes(tile, itemsize) + 2 * _block_bytes(tile, 4)
    slab_phys = num_kt * _block_bytes(tile, itemsize)
    if slab_budget_bytes is None:
        resident = (slab_phys + tile_usage) <= avail
    else:
        resident = slab_phys <= slab_budget_bytes

    # Pad K when no clean aligned divisor exists (zeros do not perturb the
    # statistics because inv_n uses the true count); slice the output back.
    if K_pad != K:
        pad = [(0, 0), (0, 0), (0, 0)]
        pad[2 if shape == "BDT" else 1] = (0, K_pad - K)
        y_in = jnp.pad(y, pad)
    else:
        y_in = y

    if shape == "BDT":
        block = (1, N, tile)
        if resident:
            # In phase 1 keep the input block index parked on the last phase-0
            # tile so no re-fetch DMA is issued (phase 1 reads the slab scratch).
            y_map = lambda m, p, k: (m, 0, k * (1 - p) + (num_kt - 1) * p)
        else:
            y_map = lambda m, p, k: (m, 0, k)
        # Phase 0 never writes o_ref; its (never-flushed-until-index-change)
        # block stays parked at k=0 and is fully overwritten by phase-1 k=0
        # before the first writeback.
        o_map = lambda m, p, k: (m, 0, p * k)
        slab_shape = (num_kt, N, tile)
    else:
        block = (1, tile, N)
        if resident:
            y_map = lambda m, p, k: (m, k * (1 - p) + (num_kt - 1) * p, 0)
        else:
            y_map = lambda m, p, k: (m, k, 0)
        o_map = lambda m, p, k: (m, p * k, 0)
        slab_shape = (num_kt, tile, N)
    param_map = lambda m, p, k: (0, 0, 0)

    scratch = [
        pltpu.VMEM((1, 1, 1), jnp.float32),   # running sum
        pltpu.VMEM((1, 1, 1), jnp.float32),   # running sum of squares
    ]
    if resident:
        scratch.append(pltpu.VMEM(slab_shape, y.dtype))   # on-chip slab copy

    n_reads = 1 if resident else 2
    cost = pl.CostEstimate(
        flops=8 * M * N * K_pad,
        transcendentals=M,
        bytes_accessed=(n_reads + 1) * M * N * K_pad * itemsize,
    )

    out = pl.pallas_call(
        _make_tiled_kernel(inv_n, shape, resident),
        out_shape=jax.ShapeDtypeStruct(y_in.shape, y.dtype),
        grid_spec=pltpu.PrefetchScalarGridSpec(
            num_scalar_prefetch=0,
            grid=(M, 2, num_kt),
            in_specs=[
                pl.BlockSpec(block, y_map),
                pl.BlockSpec(param_block, param_map),
                pl.BlockSpec(param_block, param_map),
            ],
            out_specs=pl.BlockSpec(block, o_map),
            scratch_shapes=scratch,
        ),
        compiler_params=pltpu.CompilerParams(
            dimension_semantics=(dim_sem_batch, "arbitrary", "arbitrary"),
            vmem_limit_bytes=vmem_limit_bytes,
        ),
        cost_estimate=cost,
    )(y_in, gamma_b, beta_b)

    if K_pad != K:
        out = out[:, :, :K] if shape == "BDT" else out[:, :K, :]
    return out


# ---------------------------------------------------------------------------
# Reference + tests
# ---------------------------------------------------------------------------
def _reference_gln(y, gamma, beta, shape="BDT"):
    """Pure-JAX reference mirroring the PyTorch forward."""
    if shape == "BTD":
        y = jnp.transpose(y, (0, 2, 1))
    mean = jnp.mean(y, axis=(1, 2), keepdims=True)
    var = jnp.mean((y - mean) ** 2, axis=(1, 2), keepdims=True)
    out = gamma * (y - mean) / jnp.power(var + EPS, 0.5) + beta
    if shape == "BTD":
        out = jnp.transpose(out, (0, 2, 1))
    return out


if __name__ == "__main__":
    key = jax.random.PRNGKey(0)
    k1, k2, k3, k4, k5, k6 = jax.random.split(key, 6)

    # ---- 1) Small BDT case, params as in reset_parameters(): gamma=1, beta=0
    M, N, K = 2, 4, 16  # batch, channel, length
    y = jax.random.normal(k1, (M, N, K), dtype=jnp.float32)
    gamma = jnp.ones((1, N, 1), dtype=jnp.float32)
    beta = jnp.zeros((1, N, 1), dtype=jnp.float32)
    out = jax.block_until_ready(global_layer_norm(y, gamma, beta, shape="BDT"))
    ref = _reference_gln(y, gamma, beta, shape="BDT")
    assert out.shape == y.shape and out.dtype == y.dtype
    assert jnp.allclose(out, ref, atol=1e-5, rtol=1e-5), "BDT mismatch"

    # ---- 2) Small BTD case (no transpose inside the wrapper)
    y_btd = jnp.transpose(y, (0, 2, 1))  # [M, K, N]
    out_btd = jax.block_until_ready(
        global_layer_norm(y_btd, gamma, beta, shape="BTD"))
    ref_btd = _reference_gln(y_btd, gamma, beta, shape="BTD")
    assert jnp.allclose(out_btd, ref_btd, atol=1e-5, rtol=1e-5), "BTD mismatch"

    # Common inputs for the forced tiled-path tests
    M2, N2, K2 = 2, 8, 512
    y2 = jax.random.normal(k2, (M2, N2, K2), dtype=jnp.float32)
    g2 = jax.random.normal(k3, (1, N2, 1), dtype=jnp.float32)
    b2 = jax.random.normal(k4, (1, N2, 1), dtype=jnp.float32)
    ref2 = _reference_gln(y2, g2, b2, shape="BDT")
    tiny_full = N2 * 128 * 4           # forces the tiled paths
    tiny_tile = N2 * 128 * 4           # forces tile = 128 (4 K-tiles)

    # ---- 3) Middle path (VMEM-resident slab), BDT
    out2 = jax.block_until_ready(global_layer_norm(
        y2, g2, b2, shape="BDT",
        full_block_budget_bytes=tiny_full, tile_budget_bytes=tiny_tile))
    assert jnp.allclose(out2, ref2, atol=1e-4, rtol=1e-4), "middle BDT mismatch"

    # ---- 4) Far path (HBM re-streaming), BDT
    out2b = jax.block_until_ready(global_layer_norm(
        y2, g2, b2, shape="BDT",
        full_block_budget_bytes=tiny_full, tile_budget_bytes=tiny_tile,
        slab_budget_bytes=0))
    assert jnp.allclose(out2b, ref2, atol=1e-4, rtol=1e-4), "far BDT mismatch"

    # ---- 5) Middle path, BTD layout
    y3 = jax.random.normal(k5, (M2, K2, N2), dtype=jnp.float32)  # [M, K, N]
    out3 = jax.block_until_ready(global_layer_norm(
        y3, g2, b2, shape="BTD",
        full_block_budget_bytes=tiny_full, tile_budget_bytes=tiny_tile))
    ref3 = _reference_gln(y3, g2, b2, shape="BTD")
    assert jnp.allclose(out3, ref3, atol=1e-4, rtol=1e-4), "middle BTD mismatch"

    # ---- 6) Tiled path with K padding (no clean 128-multiple divisor)
    K3 = 500
    y4 = jax.random.normal(k6, (M2, N2, K3), dtype=jnp.float32)
    out4 = jax.block_until_ready(global_layer_norm(
        y4, g2, b2, shape="BDT",
        full_block_budget_bytes=tiny_full, tile_budget_bytes=tiny_tile))
    ref4 = _reference_gln(y4, g2, b2, shape="BDT")
    assert out4.shape == y4.shape
    assert jnp.allclose(out4, ref4, atol=1e-4, rtol=1e-4), "padded BDT mismatch"

    print("KERNEL_OK")
</pallas_src>

<mosaic_0001>
module attributes {stable_mosaic.version = 11 : i64} {
  func.func @_gln_full_kernel(%arg0: i32, %arg1: memref<1x4x16xf32, #tpu.memory_space<vmem>>, %arg2: memref<1x4x1xf32, #tpu.memory_space<vmem>>, %arg3: memref<1x4x1xf32, #tpu.memory_space<vmem>>, %arg4: memref<1x4x16xf32, #tpu.memory_space<vmem>>) attributes {dimension_semantics = [#tpu.dimension_semantics<parallel>], iteration_bounds = array<i64: 2>, scalar_prefetch = 0 : i64, scratch_operands = 0 : i64, tpu.core_type = #tpu.core_type<tc>, window_params = [{transform_indices = @transform_0, window_bounds = array<i64: 1, 4, 16>}, {pipeline_mode = #tpu.pipeline_mode<synchronous>, transform_indices = @transform_1, window_bounds = array<i64: 1, 4, 1>}, {pipeline_mode = #tpu.pipeline_mode<synchronous>, transform_indices = @transform_2, window_bounds = array<i64: 1, 4, 1>}, {transform_indices = @transform_3, window_bounds = array<i64: 1, 4, 16>}]} {
    %c0 = arith.constant 0 : index
    %c0_0 = arith.constant 0 : index
    %c0_1 = arith.constant 0 : index
    %0 = vector.load %arg1[%c0, %c0_0, %c0_1] : memref<1x4x16xf32, #tpu.memory_space<vmem>>, vector<1x4x16xf32>
    %1 = vector.shape_cast %0 : vector<1x4x16xf32> to vector<1x1x4x16xf32>
    %cst = arith.constant dense<0.000000e+00> : vector<1xf32>
    %2 = vector.multi_reduction <add>, %1, %cst [1, 2, 3] : vector<1x1x4x16xf32> to vector<1xf32>
    %3 = vector.shape_cast %2 : vector<1xf32> to vector<1x1x1x1xf32>
    %4 = vector.extract %3[0, 0, 0, 0] : f32 from vector<1x1x1x1xf32>
    %5 = vector.broadcast %4 : f32 to vector<1x1x1xf32>
    %cst_2 = arith.constant 1.562500e-02 : f32
    %6 = vector.broadcast %cst_2 : f32 to vector<1x1x1xf32>
    %7 = arith.mulf %5, %6 : vector<1x1x1xf32>
    %8 = vector.broadcast %7 : vector<1x1x1xf32> to vector<1x4x16xf32>
    %9 = arith.subf %0, %8 : vector<1x4x16xf32>
    %10 = arith.mulf %9, %9 : vector<1x4x16xf32>
    %11 = vector.shape_cast %10 : vector<1x4x16xf32> to vector<1x1x4x16xf32>
    %cst_3 = arith.constant dense<0.000000e+00> : vector<1xf32>
    %12 = vector.multi_reduction <add>, %11, %cst_3 [1, 2, 3] : vector<1x1x4x16xf32> to vector<1xf32>
    %13 = vector.shape_cast %12 : vector<1xf32> to vector<1x1x1x1xf32>
    %14 = vector.extract %13[0, 0, 0, 0] : f32 from vector<1x1x1x1xf32>
    %15 = vector.broadcast %14 : f32 to vector<1x1x1xf32>
    %cst_4 = arith.constant 1.562500e-02 : f32
    %16 = vector.broadcast %cst_4 : f32 to vector<1x1x1xf32>
    %17 = arith.mulf %15, %16 : vector<1x1x1xf32>
    %c0_5 = arith.constant 0 : index
    %c0_6 = arith.constant 0 : index
    %c0_7 = arith.constant 0 : index
    %18 = vector.load %arg2[%c0_5, %c0_6, %c0_7] : memref<1x4x1xf32, #tpu.memory_space<vmem>>, vector<1x4x1xf32>
    %cst_8 = arith.constant 1.1920929E-7 : f32
    %19 = vector.broadcast %cst_8 : f32 to vector<1x1x1xf32>
    %20 = arith.addf %17, %19 : vector<1x1x1xf32>
    %21 = math.rsqrt %20 : vector<1x1x1xf32>
    %22 = vector.broadcast %21 : vector<1x1x1xf32> to vector<1x4x1xf32>
    %23 = arith.mulf %18, %22 : vector<1x4x1xf32>
    %24 = vector.broadcast %23 : vector<1x4x1xf32> to vector<1x4x16xf32>
    %25 = arith.mulf %9, %24 : vector<1x4x16xf32>
    %c0_9 = arith.constant 0 : index
    %c0_10 = arith.constant 0 : index
    %c0_11 = arith.constant 0 : index
    %26 = vector.load %arg3[%c0_9, %c0_10, %c0_11] : memref<1x4x1xf32, #tpu.memory_space<vmem>>, vector<1x4x1xf32>
    %27 = vector.broadcast %26 : vector<1x4x1xf32> to vector<1x4x16xf32>
    %28 = arith.addf %25, %27 : vector<1x4x16xf32>
    %c0_12 = arith.constant 0 : index
    %c0_13 = arith.constant 0 : index
    %c0_14 = arith.constant 0 : index
    %29 = vector.load %arg4[%c0_12, %c0_13, %c0_14] : memref<1x4x16xf32, #tpu.memory_space<vmem>>, vector<1x4x16xf32>
    tpu.vector_store %arg4[%c0_12, %c0_13, %c0_14], %28 {strides = array<i32>} : memref<1x4x16xf32, #tpu.memory_space<vmem>>, vector<1x4x16xf32>,
    return
  }
  func.func @transform_0(%arg0: i32) -> (i32, i32, i32) {
    %c0_i32 = arith.constant 0 : i32
    %c0_i32_0 = arith.constant 0 : i32
    %c0_i32_1 = arith.constant 0 : i32
    return %arg0, %c0_i32, %c0_i32_0 : i32, i32, i32
  }
  func.func @transform_1(%arg0: i32) -> (i32, i32, i32) {
    %c0_i32 = arith.constant 0 : i32
    %c0_i32_0 = arith.constant 0 : i32
    %c0_i32_1 = arith.constant 0 : i32
    %c0_i32_2 = arith.constant 0 : i32
    return %c0_i32, %c0_i32_0, %c0_i32_1 : i32, i32, i32
  }
  func.func @transform_2(%arg0: i32) -> (i32, i32, i32) {
    %c0_i32 = arith.constant 0 : i32
    %c0_i32_0 = arith.constant 0 : i32
    %c0_i32_1 = arith.constant 0 : i32
    %c0_i32_2 = arith.constant 0 : i32
    return %c0_i32, %c0_i32_0, %c0_i32_1 : i32, i32, i32
  }
  func.func @transform_3(%arg0: i32) -> (i32, i32, i32) {
    %c0_i32 = arith.constant 0 : i32
    %c0_i32_0 = arith.constant 0 : i32
    %c0_i32_1 = arith.constant 0 : i32
    return %arg0, %c0_i32, %c0_i32_0 : i32, i32, i32
  }
}

</mosaic_0001>

<bundles_post_ra>
// kernel: tpu_custom_call.1
= control target key start
LH: loop header
LB: loop body
LE: loop exit
PB: predicated region body
PF: predicated region fallthrough
CT: control target
= control target key end

     0   :  { %8 = vsyncpa [#allocation3], 0  ;;  %s523_s0 = inlined_call_operand.vmem [shape: f32[2,4,16], index: 0, kind: input, shape index: {}]   ;;  %s524_s1 = inlined_call_operand.vmem [shape: f32[1,4,1], index: 1, kind: input, shape index: {}]   ;;  %s525_s2 = inlined_call_operand.vmem [shape: f32[1,4,1], index: 2, kind: input, shape index: {}]   ;;  %s526_s3 = inlined_call_operand.hbm [shape: f32[2,4,16], index: 3, kind: output, shape index: {}]  }
   0x1   :  { %10 = vsyncpa [#allocation3 + $0x1], 0  ;;  %s427_s12 = smov 0   ;;  %s429_s13 = smov 0  }
   0x2   :  { %s431_s14 = smov 0   ;;  %s433_s15 = smov 0  }
   0x3 LB: > { %s448_s16 = sadd.s32 4294967295, %s403_s15   ;;  %s285_s17 = sadd.s32 4294967294, %s403_s15   ;;  %s403_s15 = sphi %s433_s15, %s532_s15   ;;  %s399_s14 = sphi %s431_s14, %s531_s14   ;;  %s395_s13 = sphi %s429_s13, %s530_s13   ;;  %s391_s12 = sphi %s427_s12, %s529_s12  }
   0x4   : > { %s452_s18 = sadd.s32 1, %s403_s15   ;;  %s91_s19 = sadd.s32 1, %s399_s14 }
   0x5   : > { %s88_s20 = ssub.s32 %s403_s15, %s452_s18  ;;  %p101_p0 = scmp.ne.s32.totalorder %s399_s14, %s395_s13 }
   0x6   : > { %p89_p1 = scmp.eq.s32.totalorder %s88_s20, 0  ;;  %p102_p2 = scmp.eq.s32.totalorder %s448_s16, 1 }
   0x7   : > { %p107_p3 = scmp.ne.s32.totalorder %s395_s13, %s391_s12  ;;  %p108_p4 = scmp.eq.s32.totalorder %s285_s17, 1 }
   0x8   : > { %s463_s21 = scalar_select %p89_p1, %s399_s14, %s91_s19  }
   0x9   : > { %p465_p5 = por %p102_p2, %p101_p0  ;;  %p469_p6 = por %p108_p4, %p107_p3 }
   0xa   : > { %p288_p7 = scmp.ge.s32.totalorder %s403_s15, 1  ;;  %p139_p8 = scmp.lt.s32.totalorder %s403_s15, 3 }
   0xc   : > { %p140_p9 = pnand %p288_p7, %p139_p8 }
   0xd   : > { %p162_p10 = scmp.lt.s32.totalorder (!%p140_p9), %s448_s16, 1  ;;  %s159_s8 = sand.u32 (!%p140_p9), 1, %s395_s13  }
   0xe   : > { %143 = sbr.rel (%p140_p9) target bundleno = 597 (0x255), region = 32  ;;  %s289_s9 = sshll.u32 (!%p140_p9), %s159_s8, 2 }
   0xf   : > { %s292_s10 = sshll.u32 (!%p140_p9), %s448_s16, 6  ;;  %s161_s11 = scalar_lea.vmem (!%p140_p9), [#allocation2], %s289_s9 }
  0x10   : > { %s226_s17 = sshll.u32 (!%p140_p9), %s161_s11, 4  ;;  %s406_s27 = smov (!%p140_p9), [#allocation2]   ;;  %s227_s17 = int_to_ptr.vmem [resolvable:$true] %s226_s17 }
  0x11   : > { %s343_s26 = scalar_lea.vmem (!%p140_p9), %s227_s17, 64 }
  0x12   : > { %p344_p11 = scmp.ne.s32.totalorder (!%p140_p9), %s227_s17, %s343_s26 }
  0x13   : > { %s163_s24 = scalar_select %p162_p10, %s448_s16, 1  ;;  %vm167_vm0 = vcmask 125952   ;;  %v405_v14 = vmov 0   ;;  %v194_v25 = vld [vmem:[%s524_s1] sm:$0xf] }
  0x14   : > { %339 = vset.pattern.permute.xlu1 %v405_v14  ;;  %340 = vset.pattern.permute.xlu0 %v405_v14  ;;  %v204_v28 = vld [vmem:[%s525_s2] sm:$0xf]  ;;  %p345_p12 = pnand %p344_p11, %p465_p5  ;;  %s347_s16 = sshll.u32 %s406_s27, 4  ;;  %s348_s16 = int_to_ptr.vmem [resolvable:$false] %s347_s16 }
  0x15   : > { %s290_s25 = sshll.u32 %s163_s24, 2  ;;  %s224_s24 = scalar_lea.hbm %s526_s3, %s292_s10 }
  0x16   : > { %s165_s28 = scalar_lea.vmem %s523_s0, %s290_s25  ;;  %s213_s25 = scalar_lea.sflag [#allocation3], %s159_s8 }
  0x17   : > { %v166_v0 = vld [vmem:[%s165_s28] sm:$0xf]  ;;  %p346_p13 = pneg %p345_p12  ;;  %s349_s28 = scalar_lea.vmem %s348_s16, 128 }
  0x18   : > { %v168_v1 = vsel %vm167_vm0, %v166_v0, 0.0  ;;  %p350_p0 = scmp.lt.s32.totalorder %s227_s17, %s348_s16  ;;  %p351_p1 = scmp.lt.s32.totalorder %s349_s28, %s343_s26 }
  0x19   : > { %169 = vadd.xlane.f32.xlu0 %v168_v1 }
  0x1a   : > { %p352_p2 = por %p351_p1, %p350_p0 }
  0x1c   : > { %p353_p3 = pnand %p352_p2, %p346_p13 }
  0xa2   : > { %v170_v2 = vpop.xlane.xlu0 %169 }
  0xa3   : > { %v171_v3 = vrot.slane %v170_v2, 4 }
  0xa5   : > { %v172_v4 = vadd.f32 %v171_v3, %v170_v2 }
  0xa7   : > { %v173_v5 = vrot.slane %v172_v4, 2 }
  0xa9   : > { %v174_v6 = vadd.f32 %v173_v5, %v172_v4 }
  0xab   : > { %v175_v7 = vrot.slane %v174_v6, 1 }
  0xad   : > { %v176_v8 = vadd.f32 %v175_v7, %v174_v6 }
  0xaf   : > { %295 = vpush %v176_v8 }
  0xe0   : > { %s296_s29 = spop %295 }
  0xe1   : > { %v178_v9 = vstv %s296_s29 }
  0xe2   : > { %v179_v10 = vmul.f32 0.015625, %v178_v9 }
  0xe4   : > { %v180_v11 = vsub.f32 %v166_v0, %v179_v10 }
  0xe6   : > { %v181_v12 = vmul.f32 %v180_v11, %v180_v11 }
  0xe8   : > { %v182_v13 = vsel %vm167_vm0, %v181_v12, 0.0 }
  0xe9   : > { %183 = vadd.xlane.f32.xlu0 %v182_v13 }
 0x172   : > { %v184_v15 = vpop.xlane.xlu0 %183 }
 0x173   : > { %v185_v16 = vrot.slane %v184_v15, 4 }
 0x175   : > { %v186_v17 = vadd.f32 %v185_v16, %v184_v15 }
 0x177   : > { %v187_v18 = vrot.slane %v186_v17, 2 }
 0x179   : > { %v188_v19 = vadd.f32 %v187_v18, %v186_v17 }
 0x17b   : > { %v189_v20 = vrot.slane %v188_v19, 1 }
 0x17d   : > { %v190_v21 = vadd.f32 %v189_v20, %v188_v19 }
 0x17f   : > { %297 = vpush %v190_v21 }
 0x1b0   : > { %s298_s30 = spop %297 }
 0x1b1   : > { %v192_v22 = vstv %s298_s30 }
 0x1b2   : > { %v193_v23 = vmul.f32 0.015625, %v192_v22 }
 0x1b4   : > { %v195_v24 = vadd.f32 1.1920929e-07, %v193_v23 }
 0x1b6   : > { %341 = vrsqrt.f32 %v195_v24 }
 0x1c3   : > { %v342_v26 = vpop.eup %341 }
 0x1c4   : > { %v197_v27 = vmul.f32 %v342_v26, %v194_v25 }
 0x1c6   : > { %200 = vperm.xlu1 %339, %v197_v27  }
 0x1ca   : > { %207 = vperm.xlu1 %339, %v204_v28  }
 0x241   : > { %v201_v29 = vpop.permute.xlu1 %200 }
 0x242   : > { %v203_v30 = vmul.f32 %v201_v29, %v180_v11 }
 0x245   : > { %v208_v31 = vpop.permute.xlu1 %207 }
 0x246   : > { %v210_v32 = vadd.f32 %v208_v31, %v203_v30 }
 0x248   : > { %211 = vst.msk [vmem:[%s161_s11] sm:$0xf] %vm167_vm0, %v210_v32 }
 0x249   : > { %356 = shalt.err (!%p353_p3)
}
 0x24a   : > { %s357_s29 = scalar_lea.hbm %s224_s24, 64  ;;  %s361_s5 = scalar_lea.hbm %s526_s3, 128 }
 0x24b   : > { %p358_p4 = scmp.ne.s32.totalorder %s224_s24, %s357_s29  ;;  %p362_p9 = scmp.lt.s32.totalorder %s224_s24, %s526_s3 }
 0x24c   : > { %p363_p10 = scmp.lt.s32.totalorder %s361_s5, %s357_s29 }
 0x24d   : > { %p359_p7 = pnand %p358_p4, %p465_p5 }
 0x24e   : > { %p364_p11 = por %p363_p10, %p362_p9 }
 0x24f   : > { %p360_p8 = pneg %p359_p7 }
 0x251   : > { %p365_p12 = pnand %p364_p11, %p360_p8 }
 0x253   : > { %368 = shalt.err (!%p365_p12)
}
 0x254   : > { %299 = dma.vmem_to_hbm [thread:$0]  (%p465_p5), %s227_s17, 64, %s224_s24, %s213_s25  }
 0x255 PF: > { %p305_p13 = scmp.ge.s32.totalorder %s403_s15, 2  ;;  %s238_s8 = sand.u32 1, %s391_s12  }
 0x256   : > { %s239_s9 = scalar_lea.sflag [#allocation3], %s238_s8 }
 0x257   : > { %p302_p0 = pnand %p305_p13, %p469_p6 }
 0x259   : > { %p303_p1 = pneg %p302_p0 }
 0x25b   : > { %386 = dma.done.wait (%p303_p1), %s239_s9, 64  }
 0x25c   : > { %388 = vsyncadd (%p303_p1), %s239_s9, 4294967232  ;;  %p13_p2 = scmp.ge.s32.totalorder %s452_s18, 4   ;;  %s529_s12 = smov %s395_s13 }
 0x25d   : > { %s530_s13 = smov %s399_s14  ;;  %s531_s14 = smov %s463_s21 }
 0x25e   : > { %s532_s15 = smov %s452_s18  ;;  %15 = sbr.rel (!%p13_p2) target bundleno = 3 (0x3), region = 67 }
 0x263   :  { %244 = vsyncpa [#allocation3], 1 }
 0x264   :  { %246 = vsyncpa [#allocation3 + $0x1], 1 }

</bundles_post_ra>
